<compile_context>
chip_gen: v7x
topology: tpu7x:2x2x1
jax: 0.10.0
libtpu: 0.0.40
codegen_flags: <defaults>
</compile_context>

<pallas_src>
import jax
import jax.numpy as jnp
from jax.experimental import pallas as pl
from jax.experimental.pallas import tpu as pltpu


_SLAB_WIDTHS = (1024, 512, 256, 128)   # all lane-dense (multiples of 128)


def _hswish_kernel(x_ref, o_ref):
    x = x_ref[...]
    # relu6(x + 3) = clamp(x + 3, 0, 6); weak-typed consts preserve bf16/f32.
    r = jnp.clip(x + 3.0, 0.0, 6.0)
    # * (1/6) instead of / 6: <= 1 ulp vs torch hardswish; op is HBM-bound.
    o_ref[...] = x * r * (1.0 / 6.0)


def _cdiv(a, b):
    return -(-a // b)


def _round_up(a, m):
    return _cdiv(a, m) * m


def _sublane_multiple(itemsize):
    # f32 -> 8, bf16 -> 16, int8/fp8 -> 32 (sub-32-bit dtypes pack sublanes).
    return max(8, 32 // max(int(itemsize), 1))


def _gen_params():
    """(target block bytes, scoped vmem limit bytes) per TPU generation."""
    kind = ""
    try:
        kind = jax.devices()[0].device_kind.lower()
    except Exception:
        pass
    if "v7" in kind:
        # 3.2 TB/s per TC, 64 MiB VMEM: 8 MiB blocks, 4x8 = 32 MiB live.
        return 8 << 20, 48 << 20
    # v6e / v5e / unknown: 4 MiB blocks, 4x4 = 16 MiB live (v5e default scoped
    # limit is only 16 MiB, so the explicit 32 MiB limit is what makes this
    # block size legal there).
    return 4 << 20, 32 << 20


def _choose_tile_rows(R, C, itemsize, block_bytes):
    sub = _sublane_multiple(itemsize)
    tile_r = (block_bytes // (C * itemsize) // sub) * sub
    tile_r = max(sub, tile_r)
    if tile_r >= R:
        if R < 2 * sub:
            return R                          # single full-extent block
        tile_r = _round_up(_cdiv(R, 2), sub)  # keep >= 2 pipelined steps
    # Nudge short grids to an even step count (balances v7x's two TCs).
    g = _cdiv(R, tile_r)
    if 1 < g < 16 and g % 2 == 1:
        cand = _round_up(_cdiv(R, g + 1), sub)
        if sub <= cand <= tile_r and _cdiv(R, cand) % 2 == 0:
            tile_r = cand
    return tile_r


def hswish(x: jax.Array) -> jax.Array:
    """HSwish forward. Accepts any shape; computed elementwise on TPU."""
    orig_shape = x.shape
    dtype = x.dtype
    n = x.size
    if n == 0:
        return x
    itemsize = jnp.dtype(dtype).itemsize

    flat = x.reshape(-1)

    # Adaptive slab width: free reshape, no pad/slice, on the common path.
    C = next((c for c in _SLAB_WIDTHS if n % c == 0), None)
    pad = 0
    if C is None:
        # Ragged fallback: minimal zero-pad to the next 128-multiple
        # (hswish(0) == 0, tail sliced off below). Costs one extra HBM
        # read+write each for the pad and the slice; only hit when n is not
        # a multiple of 128.
        pad = (-n) % 128
        flat = jnp.pad(flat, (0, pad))
        C = next(c for c in _SLAB_WIDTHS if (n + pad) % c == 0)
    total = n + pad
    R = total // C
    slab = flat.reshape(R, C)

    block_bytes, vmem_limit = _gen_params()
    tile_r = _choose_tile_rows(R, C, itemsize, block_bytes)
    grid = (_cdiv(R, tile_r),)   # ragged last block handled by Pallas

    out_slab = pl.pallas_call(
        _hswish_kernel,
        out_shape=jax.ShapeDtypeStruct((R, C), dtype),
        grid_spec=pltpu.PrefetchScalarGridSpec(
            num_scalar_prefetch=0,
            grid=grid,
            in_specs=[pl.BlockSpec((tile_r, C), lambda i: (i, 0))],
            out_specs=pl.BlockSpec((tile_r, C), lambda i: (i, 0)),
        ),
        compiler_params=pltpu.CompilerParams(
            dimension_semantics=("parallel",),
            vmem_limit_bytes=vmem_limit,
        ),
        # Advisory: 4 flops/elem, pure streaming read+write.
        cost_estimate=pl.CostEstimate(
            flops=4 * total,
            transcendentals=0,
            bytes_accessed=2 * total * itemsize,
        ),
    )(slab)

    out = out_slab.reshape(-1)
    if pad:
        out = out[:n]
    return out.reshape(orig_shape)


def _ref_hswish(x):
    return x * jnp.clip(x + 3.0, 0.0, 6.0) / 6.0


if __name__ == "__main__":
    key = jax.random.PRNGKey(0)

    # NCHW, consistent with the PyTorch module's conv-style inputs.
    # 2*4*16*16 = 2048 elements -> divisible slab path (C=1024), no pad/slice.
    x = jax.random.normal(key, (2, 4, 16, 16), dtype=jnp.float32) * 4.0
    y = jax.block_until_ready(hswish(x))
    assert y.shape == x.shape and y.dtype == x.dtype
    assert jnp.allclose(y, _ref_hswish(x), atol=1e-5, rtol=1e-6)

    # Ragged / non-128-multiple path (minimal-pad fallback).
    x2 = jax.random.normal(jax.random.PRNGKey(1), (3, 5, 7), dtype=jnp.float32) * 4.0
    y2 = jax.block_until_ready(hswish(x2))
    assert y2.shape == x2.shape and y2.dtype == x2.dtype
    assert jnp.allclose(y2, _ref_hswish(x2), atol=1e-5, rtol=1e-6)

    # bf16 sanity (sublane multiple 16, same kernel body).
    x3 = (jax.random.normal(jax.random.PRNGKey(2), (2, 4, 8, 16)) * 4.0).astype(jnp.bfloat16)
    y3 = jax.block_until_ready(hswish(x3))
    assert y3.shape == x3.shape and y3.dtype == x3.dtype
    assert jnp.allclose(y3.astype(jnp.float32),
                        _ref_hswish(x3.astype(jnp.float32)), atol=3e-2, rtol=3e-2)

    print("KERNEL_OK")
</pallas_src>

<mosaic_0001>
module attributes {stable_mosaic.version = 11 : i64} {
  func.func @_hswish_kernel(%arg0: i32, %arg1: memref<2x1024xf32, #tpu.memory_space<vmem>>, %arg2: memref<2x1024xf32, #tpu.memory_space<vmem>>) attributes {dimension_semantics = [#tpu.dimension_semantics<parallel>], iteration_bounds = array<i64: 1>, scalar_prefetch = 0 : i64, scratch_operands = 0 : i64, tpu.core_type = #tpu.core_type<tc>, window_params = [{transform_indices = @transform_0, window_bounds = array<i64: 2, 1024>}, {transform_indices = @transform_1, window_bounds = array<i64: 2, 1024>}]} {
    %c0 = arith.constant 0 : index
    %c0_0 = arith.constant 0 : index
    %0 = vector.load %arg1[%c0, %c0_0] : memref<2x1024xf32, #tpu.memory_space<vmem>>, vector<2x1024xf32>
    %cst = arith.constant 3.000000e+00 : f32
    %1 = vector.broadcast %cst : f32 to vector<2x1024xf32>
    %2 = arith.addf %0, %1 : vector<2x1024xf32>
    %cst_1 = arith.constant 0.000000e+00 : f32
    %cst_2 = arith.constant 6.000000e+00 : f32
    %3 = vector.broadcast %cst_1 : f32 to vector<2x1024xf32>
    %4 = arith.maximumf %3, %2 : vector<2x1024xf32>
    %5 = vector.broadcast %cst_2 : f32 to vector<2x1024xf32>
    %6 = arith.minimumf %5, %4 : vector<2x1024xf32>
    %7 = arith.mulf %0, %6 : vector<2x1024xf32>
    %cst_3 = arith.constant 0.166666672 : f32
    %8 = vector.broadcast %cst_3 : f32 to vector<2x1024xf32>
    %9 = arith.mulf %7, %8 : vector<2x1024xf32>
    %c0_4 = arith.constant 0 : index
    %c0_5 = arith.constant 0 : index
    %10 = vector.load %arg2[%c0_4, %c0_5] : memref<2x1024xf32, #tpu.memory_space<vmem>>, vector<2x1024xf32>
    tpu.vector_store %arg2[%c0_4, %c0_5], %9 {strides = array<i32>} : memref<2x1024xf32, #tpu.memory_space<vmem>>, vector<2x1024xf32>,
    return
  }
  func.func @transform_0(%arg0: i32) -> (i32, i32) {
    %c0_i32 = arith.constant 0 : i32
    %c0_i32_0 = arith.constant 0 : i32
    return %arg0, %c0_i32 : i32, i32
  }
  func.func @transform_1(%arg0: i32) -> (i32, i32) {
    %c0_i32 = arith.constant 0 : i32
    %c0_i32_0 = arith.constant 0 : i32
    return %arg0, %c0_i32 : i32, i32
  }
}

</mosaic_0001>

<bundles_post_ra>
// kernel: tpu_custom_call.1
= control target key start
LH: loop header
LB: loop body
LE: loop exit
PB: predicated region body
PF: predicated region fallthrough
CT: control target
= control target key end

     0   :  { %6 = vsyncpa [#allocation3], 0  ;;  %s136_s0 = inlined_call_operand.hbm [shape: f32[2,1024], index: 0, kind: input, shape index: {}]   ;;  %s137_s1 = inlined_call_operand.hbm [shape: f32[2,1024], index: 1, kind: output, shape index: {}]  }
   0x1   :  { %7 = vsyncpa [#allocation4], 0  ;;  %s100_s6 = smov [#allocation2]   ;;  %s52_s10 = scalar_lea.hbm %s136_s0, 256 }
   0x2   :  { %s14_s7 = sshll.u32 %s100_s6, 4  ;;  %p53_p0 = scmp.ne.s32.totalorder %s136_s0, %s52_s10  ;;  %s15_s7 = int_to_ptr.vmem [resolvable:$true] %s14_s7 }
   0x3   :  { %p56_p1 = scmp.lt.u32.totalorder %s52_s10, %s136_s0 }
   0x5   :  { %p58_p2 = pnand %p56_p1, %p53_p0 }
   0x7   :  { %61 = shalt.err (!%p58_p2)
}
   0x8   :  { %s62_s15 = scalar_lea.vmem %s15_s7, 256  ;;  %p67_p4 = scmp.lt.s32.totalorder %s15_s7, %s15_s7 }
   0x9   :  { %p63_p3 = scmp.ne.s32.totalorder %s15_s7, %s62_s15  ;;  %p68_p5 = scmp.lt.s32.totalorder %s62_s15, %s62_s15 }
   0xb   :  { %p69_p6 = por %p68_p5, %p67_p4 }
   0xd   :  { %p70_p7 = pnand %p69_p6, %p63_p3 }
   0xf   :  { %73 = shalt.err (!%p70_p7)
}
  0x10   :  { %17 = dma.hbm_to_vmem [thread:$0]  %s136_s0, 256, %s15_s7, [#allocation3]  }
  0x11   :  { %96 = dma.done.wait [#allocation3], 256  }
  0x12   :  { %97 = vsyncadd [#allocation3], 4294967040  ;;  %v21_v0 = vld [vmem:[#allocation2] sm:$0xff]  ;;  %v22_v1 = vld [vmem:[#allocation2 + $0x8] sm:$0xff]  ;;  %s101_s18 = smov [#allocation5]  }
  0x13   :  { %v23_v2 = vadd.f32 3.0, %v21_v0  ;;  %v24_v3 = vadd.f32 3.0, %v22_v1  ;;  %s41_s19 = sshll.u32 %s101_s18, 4  ;;  %s42_s19 = int_to_ptr.vmem [resolvable:$true] %s41_s19 }
  0x14   :  { %s74_s0 = scalar_lea.vmem %s42_s19, 256  ;;  %p79_p9 = scmp.lt.s32.totalorder %s42_s19, %s42_s19 }
  0x15   :  { %v25_v4 = vmax.f32 %v23_v2, 0.0  ;;  %v26_v5 = vmax.f32 %v24_v3, 0.0  ;;  %p75_p8 = scmp.ne.s32.totalorder %s42_s19, %s74_s0  ;;  %p80_p10 = scmp.lt.s32.totalorder %s74_s0, %s74_s0 }
  0x17   :  { %v27_v6 = vmin.f32 %v25_v4, 6.0  ;;  %v28_v7 = vmin.f32 %v26_v5, 6.0  ;;  %p81_p11 = por %p80_p10, %p79_p9 }
  0x19   :  { %v29_v8 = vmul.f32 %v27_v6, %v21_v0  ;;  %v30_v9 = vmul.f32 %v28_v7, %v22_v1  ;;  %p82_p12 = pnand %p81_p11, %p75_p8 }
  0x1b   :  { %v31_v10 = vmul.f32 0.16666667, %v29_v8  ;;  %v32_v11 = vmul.f32 0.16666667, %v30_v9 }
  0x1d   :  { %33 = vst [vmem:[#allocation5] sm:$0xff] %v31_v10  ;;  %34 = vst [vmem:[#allocation5 + $0x8] sm:$0xff] %v32_v11 }
  0x1e   :  { %85 = shalt.err (!%p82_p12)
}
  0x1f   :  { %s86_s22 = scalar_lea.hbm %s137_s1, 256 }
  0x20   :  { %p87_p13 = scmp.ne.s32.totalorder %s137_s1, %s86_s22  ;;  %p90_p0 = scmp.lt.u32.totalorder %s86_s22, %s137_s1 }
  0x22   :  { %p92_p1 = pnand %p90_p0, %p87_p13 }
  0x24   :  { %95 = shalt.err (!%p92_p1)
}
  0x25   :  { %44 = dma.vmem_to_hbm [thread:$0]  %s42_s19, 256, %s137_s1, [#allocation4]  }
  0x26   :  { %98 = dma.done.wait [#allocation4], 256  }
  0x27   :  { %99 = vsyncadd [#allocation4], 4294967040 }
  0x28   :  { %48 = vsyncpa [#allocation3], 1 }
  0x29   :  { %49 = vsyncpa [#allocation4], 1 }

</bundles_post_ra>
